<compile_context>
chip_gen: v5e
topology: v5e:2x2
jax: 0.10.0
libtpu: 0.0.40
codegen_flags: <defaults>
</compile_context>

<pallas_src>
import jax
import jax.numpy as jnp
from jax.experimental import pallas as pl
from jax.experimental.pallas import tpu as pltpu

IN_FEATURES = 2304      # 18 * 128 -> lane aligned
OUT_FEATURES = 2
TILE_B_BF16 = 2048      # 9.4 MiB x-buffer (bf16)
TILE_B_F32 = 1024       # 9.4 MiB x-buffer (f32)
VMEM_LIMIT_BYTES = 40 * 1024 * 1024   # > 2x x-buffer + out + weight, < v7x 64 MiB


def _linear_tanh_kernel(x_ref, w_ref, b_ref, o_ref):
    # x_ref: [tile_b, 2304] (bf16/f32, batch-tiled, auto double-buffered)
    # w_ref: [2, 2304]      (torch layout, lane-dense, VMEM-resident)
    # b_ref: [1, 2] f32     (VMEM-resident)
    # o_ref: [tile_b, 2] f32
    #
    # x @ w.T with f32 accumulation on the MXU (bf16 products are exact in f32;
    # for the f32 path, default precision already passes 1e-5 vs the f32 ref).
    y = jax.lax.dot_general(
        x_ref[...], w_ref[...],
        dimension_numbers=(((1,), (1,)), ((), ())),
        preferred_element_type=jnp.float32)
    # Note: for a partial last batch block the padded rows compute tanh on
    # uninitialized VMEM; the masked writeback makes this harmless.
    o_ref[...] = jnp.tanh(y + b_ref[...]).astype(o_ref.dtype)


def neural_similarity(x, weight, bias, *, compute_dtype=jnp.bfloat16, tile_b=None):
    """Linear(2304 -> 2) + tanh.

    x: [..., 2304]; weight: [2, 2304] (torch nn.Linear layout); bias: [2].
    compute_dtype: dtype x/weight are consumed in (bf16 default, f32 for parity).
    """
    lead = x.shape[:-1]
    x2d = x.reshape(-1, IN_FEATURES).astype(compute_dtype)
    B = x2d.shape[0]

    w = jnp.asarray(weight).reshape(OUT_FEATURES, IN_FEATURES).astype(compute_dtype)
    b = jnp.asarray(bias).reshape(1, OUT_FEATURES).astype(jnp.float32)

    if tile_b is None:
        tile_b_max = TILE_B_BF16 if jnp.dtype(compute_dtype).itemsize <= 2 else TILE_B_F32
        tile_b = B if B <= tile_b_max else tile_b_max
    grid = (pl.cdiv(B, tile_b),)

    out = pl.pallas_call(
        _linear_tanh_kernel,
        out_shape=jax.ShapeDtypeStruct((B, OUT_FEATURES), jnp.float32),
        grid=grid,
        in_specs=[
            # x: batch-tiled, auto double-buffered by the Pallas pipeline.
            pl.BlockSpec((tile_b, IN_FEATURES), lambda i: (i, 0)),
            # weight: constant block index -> fetched once, stays in VMEM.
            pl.BlockSpec((OUT_FEATURES, IN_FEATURES), lambda i: (0, 0)),
            # bias: (1, 2) f32 block, constant index -> VMEM-resident.
            pl.BlockSpec((1, OUT_FEATURES), lambda i: (0, 0)),
        ],
        out_specs=pl.BlockSpec((tile_b, OUT_FEATURES), lambda i: (i, 0)),
        compiler_params=pltpu.CompilerParams(
            dimension_semantics=("parallel",),   # shard batch across v7x's 2 TCs
            vmem_limit_bytes=VMEM_LIMIT_BYTES,
        ),
    )(x2d, w, b)

    return out.reshape(*lead, OUT_FEATURES)


if __name__ == "__main__":
    key = jax.random.PRNGKey(0)
    kx, kw, kb, kx2 = jax.random.split(key, 4)

    # Deterministic init mimicking nn.Linear's uniform(-1/sqrt(fan_in), 1/sqrt(fan_in)).
    bound = 1.0 / jnp.sqrt(jnp.float32(IN_FEATURES))
    weight = jax.random.uniform(
        kw, (OUT_FEATURES, IN_FEATURES), dtype=jnp.float32,
        minval=-bound, maxval=bound)
    bias = jax.random.uniform(
        kb, (OUT_FEATURES,), dtype=jnp.float32, minval=-bound, maxval=bound)

    def ref_f32(xv):
        return jnp.tanh(xv @ weight.T + bias)

    def ref_bf16(xv):
        xb = xv.astype(jnp.bfloat16).astype(jnp.float32)
        wb = weight.astype(jnp.bfloat16).astype(jnp.float32)
        return jnp.tanh(xb @ wb.T + bias)

    # Small-batch check (single grid step, full-dim block), default bf16 path.
    B = 8
    x = jax.random.normal(kx, (B, IN_FEATURES), dtype=jnp.float32)
    out = jax.block_until_ready(neural_similarity(x, weight, bias))
    assert out.shape == (B, OUT_FEATURES)
    assert jnp.allclose(out, ref_bf16(x), atol=1e-4, rtol=1e-4), "mismatch vs bf16 reference (B=8)"
    assert jnp.allclose(out, ref_f32(x), atol=2e-2, rtol=2e-2), "mismatch vs f32 reference (B=8)"

    # Multi-step grid with a partial last tile (forced small tile_b so the
    # pipeline/partial-block path is exercised at small shapes).
    B2 = 300
    x2 = jax.random.normal(kx2, (B2, IN_FEATURES), dtype=jnp.float32)
    out2 = jax.block_until_ready(neural_similarity(x2, weight, bias, tile_b=128))
    assert out2.shape == (B2, OUT_FEATURES)
    assert jnp.allclose(out2, ref_bf16(x2), atol=1e-4, rtol=1e-4), "mismatch vs bf16 reference (B=300)"

    # f32 parity path (matches the PyTorch f32 module to tight tolerance).
    out3 = jax.block_until_ready(
        neural_similarity(x, weight, bias, compute_dtype=jnp.float32))
    assert jnp.allclose(out3, ref_f32(x), atol=1e-5, rtol=1e-5), "mismatch vs f32 reference (f32 path)"

    print("KERNEL_OK")
</pallas_src>

<mosaic_0001>
module attributes {stable_mosaic.version = 11 : i64} {
  func.func @_linear_tanh_kernel(%arg0: i32, %arg1: memref<8x2304xbf16, #tpu.memory_space<vmem>>, %arg2: memref<2x2304xbf16, #tpu.memory_space<vmem>>, %arg3: memref<1x2xf32, #tpu.memory_space<vmem>>, %arg4: memref<8x2xf32, #tpu.memory_space<vmem>>) attributes {dimension_semantics = [#tpu.dimension_semantics<parallel>], iteration_bounds = array<i64: 1>, scalar_prefetch = 0 : i64, scratch_operands = 0 : i64, tpu.core_type = #tpu.core_type<tc>, window_params = [{transform_indices = @transform_0, window_bounds = array<i64: 8, 2304>}, {pipeline_mode = #tpu.pipeline_mode<synchronous>, transform_indices = @transform_1, window_bounds = array<i64: 2, 2304>}, {pipeline_mode = #tpu.pipeline_mode<synchronous>, transform_indices = @transform_2, window_bounds = array<i64: 1, 2>}, {transform_indices = @transform_3, window_bounds = array<i64: 8, 2>}]} {
    %c0 = arith.constant 0 : index
    %c0_0 = arith.constant 0 : index
    %0 = vector.load %arg1[%c0, %c0_0] : memref<8x2304xbf16, #tpu.memory_space<vmem>>, vector<8x2304xbf16>
    %c0_1 = arith.constant 0 : index
    %c0_2 = arith.constant 0 : index
    %1 = vector.load %arg2[%c0_1, %c0_2] : memref<2x2304xbf16, #tpu.memory_space<vmem>>, vector<2x2304xbf16>
    %cst = arith.constant dense<0.000000e+00> : vector<8x2xf32>
    %2 = tpu.matmul %0, %1, %cst {dimension_numbers = #tpu.dot_dimension_numbers<[1], [1], [0], [0], [0, 0, 1, 0], [], []>} : vector<8x2304xbf16>, vector<2x2304xbf16>, vector<8x2xf32> -> vector<8x2xf32>
    %c0_3 = arith.constant 0 : index
    %c0_4 = arith.constant 0 : index
    %3 = vector.load %arg3[%c0_3, %c0_4] : memref<1x2xf32, #tpu.memory_space<vmem>>, vector<1x2xf32>
    %4 = vector.broadcast %3 : vector<1x2xf32> to vector<8x2xf32>
    %5 = arith.addf %2, %4 : vector<8x2xf32>
    %6 = math.tanh %5 : vector<8x2xf32>
    %c0_5 = arith.constant 0 : index
    %c0_6 = arith.constant 0 : index
    %7 = vector.load %arg4[%c0_5, %c0_6] : memref<8x2xf32, #tpu.memory_space<vmem>>, vector<8x2xf32>
    tpu.vector_store %arg4[%c0_5, %c0_6], %6 {strides = array<i32>} : memref<8x2xf32, #tpu.memory_space<vmem>>, vector<8x2xf32>,
    return
  }
  func.func @transform_0(%arg0: i32) -> (i32, i32) {
    %c0_i32 = arith.constant 0 : i32
    %c0_i32_0 = arith.constant 0 : i32
    return %arg0, %c0_i32 : i32, i32
  }
  func.func @transform_1(%arg0: i32) -> (i32, i32) {
    %c0_i32 = arith.constant 0 : i32
    %c0_i32_0 = arith.constant 0 : i32
    %c0_i32_1 = arith.constant 0 : i32
    return %c0_i32, %c0_i32_0 : i32, i32
  }
  func.func @transform_2(%arg0: i32) -> (i32, i32) {
    %c0_i32 = arith.constant 0 : i32
    %c0_i32_0 = arith.constant 0 : i32
    %c0_i32_1 = arith.constant 0 : i32
    return %c0_i32, %c0_i32_0 : i32, i32
  }
  func.func @transform_3(%arg0: i32) -> (i32, i32) {
    %c0_i32 = arith.constant 0 : i32
    %c0_i32_0 = arith.constant 0 : i32
    return %arg0, %c0_i32 : i32, i32
  }
}

</mosaic_0001>

<bundles_post_ra>
// kernel: tpu_custom_call.1
= control target key start
LH: loop header
LB: loop body
LE: loop exit
PB: predicated region body
PF: predicated region fallthrough
CT: control target
= control target key end

     0   :  { %8 = vsyncpa [#allocation3], 0  ;;  %s498_s0 = inlined_call_operand.hbm [shape: bf16[8,2304], index: 0, kind: input, shape index: {}]   ;;  %s499_s1 = inlined_call_operand.hbm [shape: bf16[2,2304], index: 1, kind: input, shape index: {}]   ;;  %s500_s2 = inlined_call_operand.vmem [shape: f32[1,2], index: 2, kind: input, shape index: {}]   ;;  %s501_s3 = inlined_call_operand.vmem [shape: f32[8,2], index: 3, kind: output, shape index: {}]  }
   0x1   :  { %s15_s14 = sshll.u32 %s498_s0, 4  ;;  %s16_s14 = int_to_ptr.hbm [resolvable:$true] %s15_s14 }
   0x2   :  { %9 = vsyncpa [#allocation5], 0  ;;  %s464_s15 = smov [#allocation2]   ;;  %s26_s19 = sshll.u32 %s499_s1, 4  ;;  %s27_s19 = int_to_ptr.hbm [resolvable:$true] %s26_s19 }
   0x3   :  { %s17_s16 = sshll.u32 %s464_s15, 4  ;;  %s465_s20 = smov [#allocation4]   ;;  %s18_s16 = int_to_ptr.vmem [resolvable:$true] %s17_s16 }
   0x4   :  { %20 = dma.hbm_to_vmem [thread:$0]  %s16_s14, 1152, %s18_s16, [#allocation3]  }
   0x5   :  { %s28_s21 = sshll.u32 %s465_s20, 4  ;;  %s29_s21 = int_to_ptr.vmem [resolvable:$true] %s28_s21 }
   0x6   :  { %31 = dma.hbm_to_vmem [thread:$0]  %s27_s19, 288, %s29_s21, [#allocation5]  }
   0x7   :  { %460 = dma.done.wait [#allocation3], 1152  }
   0x8   :  { %461 = vsyncadd [#allocation3], 4294966144 }
   0x9   :  { %462 = dma.done.wait [#allocation5], 288  }
   0xa   :  { %463 = vsyncadd [#allocation5], 4294967008  ;;  %v52_v0 = vld [vmem:[#allocation4] sm:$0xff]  ;;  %v43_v1 = vld [vmem:[#allocation2] sm:$0xff]  ;;  %vm399_vm0 = vcmask 15360  }
   0xb   :  { %123 = vst [vmem:[#allocation1] ss:$9 sm:$0xff] %v52_v0  ;;  %v44_v2 = vld [vmem:[#allocation2 + $0x8] sm:$0xff]  ;;  %v53_v3 = vld [vmem:[#allocation4 + $0x8] sm:$0xff]  ;;  %v68_v7 = vunpack.c.l.b16 %v43_v1  ;;  %v69_v8 = vunpack.c.h.b16 %v43_v1  ;;  %v46_v25 = vld [vmem:[#allocation2 + $0x18] sm:$0xff] }
   0xc   :  { %v70_v10 = vunpack.c.l.b16 %v44_v2  ;;  %v71_v11 = vunpack.c.h.b16 %v44_v2  ;;  %v45_v24 = vld [vmem:[#allocation2 + $0x10] sm:$0xff]  ;;  %v74_v28 = vunpack.c.l.b16 %v46_v25  ;;  %v75_v29 = vunpack.c.h.b16 %v46_v25  ;;  %v54_v38 = vld [vmem:[#allocation4 + $0x10] sm:$0x3]  ;;  %v47_v39 = vld [vmem:[#allocation2 + $0x20] sm:$0xff] }
   0xd   :  { %v86_v16 = vpack.c.b16 %v68_v7, %v68_v7  ;;  %v87_v17 = vpack.c.b16 %v69_v8, %v69_v8  ;;  %v72_v26 = vunpack.c.l.b16 %v45_v24  ;;  %v73_v27 = vunpack.c.h.b16 %v45_v24  ;;  %v48_v40 = vld [vmem:[#allocation2 + $0x28] sm:$0xff]  ;;  %v49_v51 = vld [vmem:[#allocation2 + $0x30] sm:$0xff]  ;;  %v50_v52 = vld [vmem:[#allocation2 + $0x38] sm:$0xff] }
   0xe   :  { %v88_v18 = vpack.c.b16 %v70_v10, %v70_v10  ;;  %v89_v19 = vpack.c.b16 %v71_v11, %v71_v11  ;;  %v92_v32 = vpack.c.b16 %v74_v28, %v74_v28  ;;  %v93_v33 = vpack.c.b16 %v75_v29, %v75_v29  ;;  %v51_v61 = vld [vmem:[#allocation2 + $0x40] sm:$0xff]  ;;  %v409_v8 = vld [vmem:[%s500_s2] ss:$0 sm:$0xff] }
   0xf   :  { %v90_v30 = vpack.c.b16 %v72_v26, %v72_v26  ;;  %v91_v31 = vpack.c.b16 %v73_v27, %v73_v27  ;;  %v76_v41 = vunpack.c.l.b16 %v47_v39  ;;  %v77_v42 = vunpack.c.h.b16 %v47_v39 }
  0x10   :  { %v78_v43 = vunpack.c.l.b16 %v48_v40  ;;  %v79_v44 = vunpack.c.h.b16 %v48_v40  ;;  %v80_v53 = vunpack.c.l.b16 %v49_v51  ;;  %v81_v54 = vunpack.c.h.b16 %v49_v51 }
  0x11   :  { %v94_v45 = vpack.c.b16 %v76_v41, %v76_v41  ;;  %v95_v46 = vpack.c.b16 %v77_v42, %v77_v42  ;;  %v82_v55 = vunpack.c.l.b16 %v50_v52  ;;  %v83_v56 = vunpack.c.h.b16 %v50_v52 }
  0x12   :  { %v124_v4 = vld [vmem:[#allocation1] sm:$0xff]  ;;  %v125_v5 = vld [vmem:[#allocation1 + $0x9] sm:$0xff]  ;;  %v126_v6 = vld [vmem:[#allocation1 + $0x12] sm:$0xff]  ;;  %v96_v47 = vpack.c.b16 %v78_v43, %v78_v43  ;;  %v97_v48 = vpack.c.b16 %v79_v44, %v79_v44  ;;  %v98_v57 = vpack.c.b16 %v80_v53, %v80_v53  ;;  %v99_v58 = vpack.c.b16 %v81_v54, %v81_v54 }
  0x13   :  { %171 = vmatpush.bf16.xpose.msra.mxu0 %v124_v4  ;;  %184 = vmatpush.bf16.xpose.msra.mxu1 %v125_v5  ;;  %v127_v9 = vld [vmem:[#allocation1 + $0x1b] sm:$0xff]  ;;  %v128_v12 = vld [vmem:[#allocation1 + $0x24] sm:$0xff]  ;;  %v129_v13 = vld [vmem:[#allocation1 + $0x2d] sm:$0xff]  ;;  %v100_v59 = vpack.c.b16 %v82_v55, %v82_v55  ;;  %v101_v60 = vpack.c.b16 %v83_v56, %v83_v56  ;;  %v84_v62 = vunpack.c.l.b16 %v51_v61  ;;  %v85_v63 = vunpack.c.h.b16 %v51_v61 }
  0x14   :  { %197 = vmatpush.bf16.xpose.msra.mxu2 %v126_v6  ;;  %210 = vmatpush.bf16.xpose.msra.mxu3 %v127_v9  ;;  %v130_v14 = vld [vmem:[#allocation1 + $0x36] sm:$0xff]  ;;  %v131_v15 = vld [vmem:[#allocation1 + $0x3f] sm:$0xff] }
  0x15   :  { %133 = vst [vmem:[#allocation1] ss:$9 sm:$0xff] %v53_v3  ;;  %v102_v0 = vpack.c.b16 %v84_v62, %v84_v62  ;;  %v103_v1 = vpack.c.b16 %v85_v63, %v85_v63 }
  0x1a   :  { %172 = vmatmul.bf16.vlgmr.msra.gmra.mxu0 %v86_v16  ;;  %185 = vmatmul.bf16.vlgmr.msra.gmra.mxu1 %v87_v17 }
  0x1b   :  { %223 = vmatpush.bf16.xpose.msrb.mxu0 %v128_v12  ;;  %236 = vmatpush.bf16.xpose.msrb.mxu1 %v129_v13 }
  0x1c   :  { %249 = vmatpush.bf16.xpose.msrb.mxu2 %v130_v14  ;;  %262 = vmatpush.bf16.xpose.msrb.mxu3 %v131_v15  ;;  %v134_v20 = vld [vmem:[#allocation1] sm:$0xff]  ;;  %v135_v21 = vld [vmem:[#allocation1 + $0x9] sm:$0xff]  ;;  %v136_v22 = vld [vmem:[#allocation1 + $0x12] sm:$0xff] }
  0x1d   :  { %198 = vmatmul.bf16.vlgmr.msra.gmra.mxu2 %v88_v18  ;;  %211 = vmatmul.bf16.vlgmr.msra.gmra.mxu3 %v89_v19  ;;  %v137_v23 = vld [vmem:[#allocation1 + $0x1b] sm:$0xff]  ;;  %v138_v34 = vld [vmem:[#allocation1 + $0x24] sm:$0xff]  ;;  %v139_v35 = vld [vmem:[#allocation1 + $0x2d] sm:$0xff] }
  0x1e   :  { %v140_v36 = vld [vmem:[#allocation1 + $0x36] sm:$0xff]  ;;  %v141_v37 = vld [vmem:[#allocation1 + $0x3f] sm:$0xff] }
  0x1f   :  { %143 = vst [vmem:[#allocation1] ss:$9 sm:$0xff] %v54_v38 }
  0x23   :  { %275 = vmatpush.bf16.xpose.msra.mxu0 %v134_v20  ;;  %288 = vmatpush.bf16.xpose.msra.mxu1 %v135_v21 }
  0x24   :  { %301 = vmatpush.bf16.xpose.msra.mxu2 %v136_v22  ;;  %314 = vmatpush.bf16.xpose.msra.mxu3 %v137_v23 }
  0x26   :  { %v144_v49 = vld [vmem:[#allocation1] sm:$0xff]  ;;  %v145_v50 = vld [vmem:[#allocation1 + $0x9] sm:$0xff] }
  0x2a   :  { %224 = vmatmul.bf16.vlgmr.msrb.gmra.mxu0 %v90_v30  ;;  %237 = vmatmul.bf16.vlgmr.msrb.gmra.mxu1 %v91_v31 }
  0x2b   :  { %327 = vmatpush.bf16.xpose.msrb.mxu0 %v138_v34  ;;  %340 = vmatpush.bf16.xpose.msrb.mxu1 %v139_v35 }
  0x2d   :  { %250 = vmatmul.bf16.vlgmr.msrb.gmra.mxu2 %v92_v32  ;;  %263 = vmatmul.bf16.vlgmr.msrb.gmra.mxu3 %v93_v33 }
  0x2e   :  { %353 = vmatpush.bf16.xpose.msrb.mxu2 %v140_v36  ;;  %366 = vmatpush.bf16.xpose.msrb.mxu3 %v141_v37 }
  0x3a   :  { %276 = vmatmul.bf16.vlgmr.msra.gmra.mxu0 %v94_v45  ;;  %289 = vmatmul.bf16.vlgmr.msra.gmra.mxu1 %v95_v46 }
  0x3b   :  { %379 = vmatpush.bf16.xpose.msra.mxu0 %v144_v49  ;;  %392 = vmatpush.bf16.xpose.msra.mxu1 %v145_v50 }
  0x3d   :  { %302 = vmatmul.bf16.vlgmr.msra.gmra.mxu2 %v96_v47  ;;  %315 = vmatmul.bf16.vlgmr.msra.gmra.mxu3 %v97_v48 }
  0x4a   :  { %328 = vmatmul.bf16.vlgmr.msrb.gmra.mxu0 %v98_v57  ;;  %341 = vmatmul.bf16.vlgmr.msrb.gmra.mxu1 %v99_v58 }
  0x4d   :  { %354 = vmatmul.bf16.vlgmr.msrb.gmra.mxu2 %v100_v59  ;;  %367 = vmatmul.bf16.vlgmr.msrb.gmra.mxu3 %v101_v60 }
  0x5a   :  { %380 = vmatmul.bf16.vlgmr.msra.gmra.mxu0 %v102_v0  ;;  %393 = vmatmul.bf16.vlgmr.msra.gmra.mxu1 %v103_v1 }
  0x97   :  { %v173_v2 = vpop.f32.mrf.mxu0  ;;  %v186_v3 = vpop.f32.mrf.mxu1 }
  0x98   :  { %v174_v13 = vadd.f32 %v409_v8, %v173_v2 }
  0x9a   :  { %v187_v14 = vadd.f32 %v186_v3, %v174_v13 }
  0x9f   :  { %v175_v6 = vpop.f32.mrf.mxu0  ;;  %v188_v7 = vpop.f32.mrf.mxu1 }
  0xa0   :  { %v199_v4 = vpop.f32.mrf.mxu2  ;;  %v212_v5 = vpop.f32.mrf.mxu3 }
  0xa1   :  { %v200_v15 = vadd.f32 %v199_v4, %v187_v14 }
  0xa3   :  { %v213_v20 = vadd.f32 %v212_v5, %v200_v15 }
  0xa7   :  { %v225_v11 = vpop.f32.mrf.mxu0  ;;  %v238_v12 = vpop.f32.mrf.mxu1 }
  0xa8   :  { %v201_v9 = vpop.f32.mrf.mxu2  ;;  %v214_v10 = vpop.f32.mrf.mxu3  ;;  %v226_v21 = vadd.f32 %v225_v11, %v213_v20 }
  0xaa   :  { %v239_v26 = vadd.f32 %v238_v12, %v226_v21 }
  0xaf   :  { %v227_v18 = vpop.f32.mrf.mxu0  ;;  %v240_v19 = vpop.f32.mrf.mxu1 }
  0xb0   :  { %v251_v16 = vpop.f32.mrf.mxu2  ;;  %v264_v17 = vpop.f32.mrf.mxu3 }
  0xb1   :  { %v252_v27 = vadd.f32 %v251_v16, %v239_v26 }
  0xb3   :  { %v265_v28 = vadd.f32 %v264_v17, %v252_v27 }
  0xb7   :  { %v277_v24 = vpop.f32.mrf.mxu0  ;;  %v290_v25 = vpop.f32.mrf.mxu1 }
  0xb8   :  { %v253_v22 = vpop.f32.mrf.mxu2  ;;  %v266_v23 = vpop.f32.mrf.mxu3  ;;  %v278_v33 = vadd.f32 %v277_v24, %v265_v28 }
  0xba   :  { %v291_v34 = vadd.f32 %v290_v25, %v278_v33 }
  0xbf   :  { %v279_v31 = vpop.f32.mrf.mxu0  ;;  %v292_v32 = vpop.f32.mrf.mxu1 }
  0xc0   :  { %v303_v29 = vpop.f32.mrf.mxu2  ;;  %v316_v30 = vpop.f32.mrf.mxu3 }
  0xc1   :  { %v304_v35 = vadd.f32 %v303_v29, %v291_v34 }
  0xc3   :  { %v317_v40 = vadd.f32 %v316_v30, %v304_v35 }
  0xc7   :  { %v329_v38 = vpop.f32.mrf.mxu0  ;;  %v342_v39 = vpop.f32.mrf.mxu1 }
  0xc8   :  { %v305_v36 = vpop.f32.mrf.mxu2  ;;  %v318_v37 = vpop.f32.mrf.mxu3  ;;  %v330_v41 = vadd.f32 %v329_v38, %v317_v40 }
  0xca   :  { %v343_v46 = vadd.f32 %v342_v39, %v330_v41 }
  0xcf   :  { %v331_v44 = vpop.f32.mrf.mxu0  ;;  %v344_v45 = vpop.f32.mrf.mxu1 }
  0xd0   :  { %v355_v42 = vpop.f32.mrf.mxu2  ;;  %v368_v43 = vpop.f32.mrf.mxu3 }
  0xd1   :  { %v356_v47 = vadd.f32 %v355_v42, %v343_v46 }
  0xd3   :  { %v369_v48 = vadd.f32 %v368_v43, %v356_v47 }
  0xd7   :  { %v381_v51 = vpop.f32.mrf.mxu0  ;;  %v394_v52 = vpop.f32.mrf.mxu1 }
  0xd8   :  { %v357_v49 = vpop.f32.mrf.mxu2  ;;  %v370_v50 = vpop.f32.mrf.mxu3  ;;  %v382_v53 = vadd.f32 %v381_v51, %v369_v48 }
  0xda   :  { %v395_v54 = vadd.f32 %v394_v52, %v382_v53 }
  0xdc   :  { %410 = vtanh.f32 %v395_v54 }
  0xdf   :  { %v383_v55 = vpop.f32.mrf.mxu0  ;;  %v396_v56 = vpop.f32.mrf.mxu1 }
  0xe2   :  { %v411_v57 = vpop.eup %410 }
  0xe3   :  { %400 = vst.msk [vmem:[%s501_s3] sm:$0xff] %vm399_vm0, %v411_v57 }
  0xe4   :  { %405 = vsyncpa [#allocation3], 1 }
  0xe5   :  { %406 = vsyncpa [#allocation5], 1 }

</bundles_post_ra>
